<compile_context>
chip_gen: v7x
topology: tpu7x:2x2x1
jax: 0.10.0
libtpu: 0.0.40
codegen_flags: <defaults>
</compile_context>

<pallas_src>
import functools

import numpy as np
import jax
import jax.numpy as jnp
from jax import lax
from jax.experimental import pallas as pl
from jax.experimental.pallas import tpu as pltpu


# ----------------------------------------------------------------------------
# Fused LMU-cell kernel: 6 MXU matmuls + adds + tanh, all in VMEM/vregs.
# ----------------------------------------------------------------------------
def _lmu_cell_kernel(x_ref, h_ref, m_ref,
                     xm_ref, hm_ref, am_ref,
                     wx_ref, wh_ref, wm_ref,
                     h_out_ref, m_out_ref, *, activation):
    f32 = jnp.float32
    x = x_ref[...]
    h = h_ref[...]
    m = m_ref[...]

    # m_new = x @ (e_x B^T) + h @ (e_h B^T) + m @ (I + A^T + e_m B^T)
    m_new = (jnp.dot(x, xm_ref[...], preferred_element_type=f32)
             + jnp.dot(h, hm_ref[...], preferred_element_type=f32)
             + jnp.dot(m, am_ref[...], preferred_element_type=f32))

    pre = (jnp.dot(x, wx_ref[...], preferred_element_type=f32)
           + jnp.dot(h, wh_ref[...], preferred_element_type=f32)
           + jnp.dot(m_new, wm_ref[...], preferred_element_type=f32))
    h_new = jnp.tanh(pre) if activation == 'tanh' else pre

    m_out_ref[...] = m_new
    h_out_ref[...] = h_new


def _round_up(x, n):
    return ((x + n - 1) // n) * n


def lmu_cell_forward(inputs, states, params, *, hidden_activation='tanh'):
    """Single LMU cell step via one fused Pallas kernel. Returns (h, (h, m))."""
    h, m = states
    B, D = inputs.shape
    U = h.shape[-1]
    O = m.shape[-1]
    f32 = jnp.float32

    x = inputs.astype(f32)
    h = h.astype(f32)
    m = m.astype(f32)
    ie = params['input_encoders'].astype(f32)    # (D, 1)
    he = params['hidden_encoders'].astype(f32)   # (U, 1)
    me = params['memory_encoders'].astype(f32)   # (O, 1)
    wx = params['input_kernel'].astype(f32)      # (D, U)
    wh = params['hidden_kernel'].astype(f32)     # (U, U)
    wm = params['memory_kernel'].astype(f32)     # (O, U)
    at = params['AT'].astype(f32)                # (O, O)
    bt = params['BT'].astype(f32)                # (1, O)

    # Host-side weight fold (mathematically identical to the torch forward):
    #   u = x@ie + h@he + m@me ;  m' = m + m@AT + u@BT
    #     => m' = x@(ie BT) + h@(he BT) + m@(I + AT + me BT)
    # Outer products are formed by broadcasting (exact f32, no matmul).
    xm = ie * bt                                   # (D, O)
    hm = he * bt                                   # (U, O)
    am = jnp.eye(O, dtype=f32) + at + me * bt      # (O, O)

    # Lane/sublane-friendly padding (zero pad is exact for this computation).
    Dp, Up, Op = _round_up(D, 128), _round_up(U, 128), _round_up(O, 128)
    tb = 128 if B > 128 else _round_up(B, 8)
    Bp = _round_up(B, tb)

    def pad2(a, rows, cols):
        return jnp.pad(a, ((0, rows - a.shape[0]), (0, cols - a.shape[1])))

    xp, hp_, mp = pad2(x, Bp, Dp), pad2(h, Bp, Up), pad2(m, Bp, Op)
    xmp, hmp, amp = pad2(xm, Dp, Op), pad2(hm, Up, Op), pad2(am, Op, Op)
    wxp, whp, wmp = pad2(wx, Dp, Up), pad2(wh, Up, Up), pad2(wm, Op, Up)

    def row_spec(cols):    # batch-tiled operands / outputs
        return pl.BlockSpec((tb, cols), lambda i: (i, 0))

    def full_spec(rows, cols):   # VMEM-resident weights (same block every step)
        return pl.BlockSpec((rows, cols), lambda i: (0, 0))

    kernel = functools.partial(_lmu_cell_kernel, activation=hidden_activation)

    h_new_p, m_new_p = pl.pallas_call(
        kernel,
        out_shape=(jax.ShapeDtypeStruct((Bp, Up), f32),
                   jax.ShapeDtypeStruct((Bp, Op), f32)),
        grid=(Bp // tb,),
        in_specs=[row_spec(Dp), row_spec(Up), row_spec(Op),
                  full_spec(Dp, Op), full_spec(Up, Op), full_spec(Op, Op),
                  full_spec(Dp, Up), full_spec(Up, Up), full_spec(Op, Up)],
        out_specs=(row_spec(Up), row_spec(Op)),
        compiler_params=pltpu.CompilerParams(
            dimension_semantics=("parallel",),
            vmem_limit_bytes=32 * 1024 * 1024,
        ),
    )(xp, hp_, mp, xmp, hmp, amp, wxp, whp, wmp)

    h_new = h_new_p[:B, :U]
    m_new = m_new_p[:B, :O]
    return h_new, (h_new, m_new)


# ----------------------------------------------------------------------------
# Pure-JAX reference (unfolded math, mirrors the torch forward exactly).
# ----------------------------------------------------------------------------
def lmu_cell_reference(inputs, states, params, *, hidden_activation='tanh'):
    h, m = states
    dot = functools.partial(jnp.dot, precision=lax.Precision.HIGHEST)
    u = (dot(inputs, params['input_encoders'])
         + dot(h, params['hidden_encoders'])
         + dot(m, params['memory_encoders']))
    m_new = m + dot(m, params['AT']) + dot(u, params['BT'])
    pre = (dot(inputs, params['input_kernel'])
           + dot(h, params['hidden_kernel'])
           + dot(m_new, params['memory_kernel']))
    h_new = jnp.tanh(pre) if hidden_activation == 'tanh' else pre
    return h_new, (h_new, m_new)


# ----------------------------------------------------------------------------
# Parameter construction: Legendre-delay state space, ZOH discretization (dt=1)
# and initializers mirroring LMUCell defaults.
# ----------------------------------------------------------------------------
def _lmu_state_space(order, theta):
    """Continuous-time (A, B) of the Legendre delay system (LegendreDelay)."""
    Q = np.arange(order)
    R = (2.0 * Q + 1.0)[:, None] / float(theta)
    i, j = np.meshgrid(Q, Q, indexing='ij')
    A = np.where(i < j, -1.0, (-1.0) ** (i - j + 1)) * R
    B = ((-1.0) ** Q)[:, None] * R
    return A, B


def _expm(A, terms=24):
    """Small-matrix expm via scaling-and-squaring + Taylor (float64)."""
    A = np.asarray(A, dtype=np.float64)
    n = A.shape[0]
    nrm = np.linalg.norm(A, 1)
    k = int(np.ceil(np.log2(nrm / 0.5))) if nrm > 0.5 else 0
    As = A / (2.0 ** k)
    E = np.eye(n)
    term = np.eye(n)
    for p in range(1, terms + 1):
        term = term @ As / p
        E = E + term
    for _ in range(k):
        E = E @ E
    return E


def init_lmu_params(key, input_dim, units, order, theta):
    """Mirrors LMUCell defaults: lecun/kaiming-uniform encoders, zero memory
    encoder, glorot-normal kernels, AT/BT from a ZOH-discretized Legendre
    delay system with _A = Ad - I (init distributions are approximations of
    the torch initializers; the forward math does not depend on them)."""
    A_ct, B_ct = _lmu_state_space(order, theta)
    Ad = _expm(A_ct)                                             # ZOH, dt = 1
    Bd = np.linalg.solve(A_ct, (Ad - np.eye(order)) @ B_ct)
    A_disc = Ad - np.eye(order)

    k_ie, k_he, k_ik, k_hk, k_mk = jax.random.split(key, 5)

    def lecun_uniform(k, shape):
        bound = float(np.sqrt(3.0 / shape[0]))
        return jax.random.uniform(k, shape, jnp.float32, -bound, bound)

    def glorot_normal(k, shape):     # torch xavier_normal_
        std = float(np.sqrt(2.0 / (shape[0] + shape[1])))
        return std * jax.random.normal(k, shape, jnp.float32)

    return dict(
        input_encoders=lecun_uniform(k_ie, (input_dim, 1)),
        hidden_encoders=lecun_uniform(k_he, (units, 1)),
        memory_encoders=jnp.zeros((order, 1), jnp.float32),   # Constant(0)
        input_kernel=glorot_normal(k_ik, (input_dim, units)),
        hidden_kernel=glorot_normal(k_hk, (units, units)),
        memory_kernel=glorot_normal(k_mk, (order, units)),
        AT=jnp.asarray(A_disc.T, jnp.float32),                # (order, order)
        BT=jnp.asarray(Bd.T, jnp.float32),                    # (1, order)
    )


if __name__ == "__main__":
    B, INPUT_DIM, UNITS, ORDER = 2, 4, 32, 8
    THETA, SEQ = 4.0, 8

    key = jax.random.PRNGKey(0)
    kparam, kx = jax.random.split(key)
    params = init_lmu_params(kparam, INPUT_DIM, UNITS, ORDER, THETA)

    xs = jax.random.normal(kx, (SEQ, B, INPUT_DIM), jnp.float32)
    h0 = jnp.zeros((B, UNITS), jnp.float32)
    m0 = jnp.zeros((B, ORDER), jnp.float32)

    step = jax.jit(lambda x, st: lmu_cell_forward(x, st, params))

    # --- single cell step (the torch forward) ---
    out, (h1, m1) = step(xs[0], (h0, m0))
    jax.block_until_ready((out, h1, m1))
    out_r, (h1_r, m1_r) = lmu_cell_reference(xs[0], (h0, m0), params)
    assert out.shape == (B, UNITS) and m1.shape == (B, ORDER)
    np.testing.assert_allclose(np.asarray(h1), np.asarray(h1_r),
                               rtol=1e-3, atol=1e-3)
    np.testing.assert_allclose(np.asarray(m1), np.asarray(m1_r),
                               rtol=1e-3, atol=1e-3)

    # --- short recurrence (SEQ steps) to exercise state carry ---
    st_p = (h0, m0)
    st_r = (h0, m0)
    for t in range(SEQ):
        _, st_p = step(xs[t], st_p)
        _, st_r = lmu_cell_reference(xs[t], st_r, params)
    jax.block_until_ready(st_p)
    np.testing.assert_allclose(np.asarray(st_p[0]), np.asarray(st_r[0]),
                               rtol=2e-3, atol=2e-3)
    np.testing.assert_allclose(np.asarray(st_p[1]), np.asarray(st_r[1]),
                               rtol=2e-3, atol=2e-3)

    print("KERNEL_OK")
</pallas_src>

<mosaic_0001>
module attributes {stable_mosaic.version = 11 : i64} {
  func.func @_lmu_cell_kernel(%arg0: i32, %arg1: memref<8x128xf32, #tpu.memory_space<vmem>>, %arg2: memref<8x128xf32, #tpu.memory_space<vmem>>, %arg3: memref<8x128xf32, #tpu.memory_space<vmem>>, %arg4: memref<128x128xf32, #tpu.memory_space<vmem>>, %arg5: memref<128x128xf32, #tpu.memory_space<vmem>>, %arg6: memref<128x128xf32, #tpu.memory_space<vmem>>, %arg7: memref<128x128xf32, #tpu.memory_space<vmem>>, %arg8: memref<128x128xf32, #tpu.memory_space<vmem>>, %arg9: memref<128x128xf32, #tpu.memory_space<vmem>>, %arg10: memref<8x128xf32, #tpu.memory_space<vmem>>, %arg11: memref<8x128xf32, #tpu.memory_space<vmem>>) attributes {dimension_semantics = [#tpu.dimension_semantics<parallel>], iteration_bounds = array<i64: 1>, scalar_prefetch = 0 : i64, scratch_operands = 0 : i64, tpu.core_type = #tpu.core_type<tc>, window_params = [{transform_indices = @transform_0, window_bounds = array<i64: 8, 128>}, {transform_indices = @transform_1, window_bounds = array<i64: 8, 128>}, {transform_indices = @transform_2, window_bounds = array<i64: 8, 128>}, {pipeline_mode = #tpu.pipeline_mode<synchronous>, transform_indices = @transform_3, window_bounds = array<i64: 128, 128>}, {pipeline_mode = #tpu.pipeline_mode<synchronous>, transform_indices = @transform_4, window_bounds = array<i64: 128, 128>}, {pipeline_mode = #tpu.pipeline_mode<synchronous>, transform_indices = @transform_5, window_bounds = array<i64: 128, 128>}, {pipeline_mode = #tpu.pipeline_mode<synchronous>, transform_indices = @transform_6, window_bounds = array<i64: 128, 128>}, {pipeline_mode = #tpu.pipeline_mode<synchronous>, transform_indices = @transform_7, window_bounds = array<i64: 128, 128>}, {pipeline_mode = #tpu.pipeline_mode<synchronous>, transform_indices = @transform_8, window_bounds = array<i64: 128, 128>}, {transform_indices = @transform_9, window_bounds = array<i64: 8, 128>}, {transform_indices = @transform_10, window_bounds = array<i64: 8, 128>}]} {
    %c0 = arith.constant 0 : index
    %c0_0 = arith.constant 0 : index
    %0 = vector.load %arg1[%c0, %c0_0] : memref<8x128xf32, #tpu.memory_space<vmem>>, vector<8x128xf32>
    %c0_1 = arith.constant 0 : index
    %c0_2 = arith.constant 0 : index
    %1 = vector.load %arg2[%c0_1, %c0_2] : memref<8x128xf32, #tpu.memory_space<vmem>>, vector<8x128xf32>
    %c0_3 = arith.constant 0 : index
    %c0_4 = arith.constant 0 : index
    %2 = vector.load %arg3[%c0_3, %c0_4] : memref<8x128xf32, #tpu.memory_space<vmem>>, vector<8x128xf32>
    %c0_5 = arith.constant 0 : index
    %c0_6 = arith.constant 0 : index
    %3 = vector.load %arg4[%c0_5, %c0_6] : memref<128x128xf32, #tpu.memory_space<vmem>>, vector<128x128xf32>
    %cst = arith.constant dense<0.000000e+00> : vector<8x128xf32>
    %4 = tpu.matmul %0, %3, %cst {dimension_numbers = #tpu.dot_dimension_numbers<[1], [0], [0], [1], [0, 0, 1, 1], [], []>} : vector<8x128xf32>, vector<128x128xf32>, vector<8x128xf32> -> vector<8x128xf32>
    %c0_7 = arith.constant 0 : index
    %c0_8 = arith.constant 0 : index
    %5 = vector.load %arg5[%c0_7, %c0_8] : memref<128x128xf32, #tpu.memory_space<vmem>>, vector<128x128xf32>
    %cst_9 = arith.constant dense<0.000000e+00> : vector<8x128xf32>
    %6 = tpu.matmul %1, %5, %cst_9 {dimension_numbers = #tpu.dot_dimension_numbers<[1], [0], [0], [1], [0, 0, 1, 1], [], []>} : vector<8x128xf32>, vector<128x128xf32>, vector<8x128xf32> -> vector<8x128xf32>
    %7 = arith.addf %4, %6 : vector<8x128xf32>
    %c0_10 = arith.constant 0 : index
    %c0_11 = arith.constant 0 : index
    %8 = vector.load %arg6[%c0_10, %c0_11] : memref<128x128xf32, #tpu.memory_space<vmem>>, vector<128x128xf32>
    %cst_12 = arith.constant dense<0.000000e+00> : vector<8x128xf32>
    %9 = tpu.matmul %2, %8, %cst_12 {dimension_numbers = #tpu.dot_dimension_numbers<[1], [0], [0], [1], [0, 0, 1, 1], [], []>} : vector<8x128xf32>, vector<128x128xf32>, vector<8x128xf32> -> vector<8x128xf32>
    %10 = arith.addf %7, %9 : vector<8x128xf32>
    %c0_13 = arith.constant 0 : index
    %c0_14 = arith.constant 0 : index
    %11 = vector.load %arg7[%c0_13, %c0_14] : memref<128x128xf32, #tpu.memory_space<vmem>>, vector<128x128xf32>
    %cst_15 = arith.constant dense<0.000000e+00> : vector<8x128xf32>
    %12 = tpu.matmul %0, %11, %cst_15 {dimension_numbers = #tpu.dot_dimension_numbers<[1], [0], [0], [1], [0, 0, 1, 1], [], []>} : vector<8x128xf32>, vector<128x128xf32>, vector<8x128xf32> -> vector<8x128xf32>
    %c0_16 = arith.constant 0 : index
    %c0_17 = arith.constant 0 : index
    %13 = vector.load %arg8[%c0_16, %c0_17] : memref<128x128xf32, #tpu.memory_space<vmem>>, vector<128x128xf32>
    %cst_18 = arith.constant dense<0.000000e+00> : vector<8x128xf32>
    %14 = tpu.matmul %1, %13, %cst_18 {dimension_numbers = #tpu.dot_dimension_numbers<[1], [0], [0], [1], [0, 0, 1, 1], [], []>} : vector<8x128xf32>, vector<128x128xf32>, vector<8x128xf32> -> vector<8x128xf32>
    %15 = arith.addf %12, %14 : vector<8x128xf32>
    %c0_19 = arith.constant 0 : index
    %c0_20 = arith.constant 0 : index
    %16 = vector.load %arg9[%c0_19, %c0_20] : memref<128x128xf32, #tpu.memory_space<vmem>>, vector<128x128xf32>
    %cst_21 = arith.constant dense<0.000000e+00> : vector<8x128xf32>
    %17 = tpu.matmul %10, %16, %cst_21 {dimension_numbers = #tpu.dot_dimension_numbers<[1], [0], [0], [1], [0, 0, 1, 1], [], []>} : vector<8x128xf32>, vector<128x128xf32>, vector<8x128xf32> -> vector<8x128xf32>
    %18 = arith.addf %15, %17 : vector<8x128xf32>
    %19 = math.tanh %18 : vector<8x128xf32>
    %c0_22 = arith.constant 0 : index
    %c0_23 = arith.constant 0 : index
    %20 = vector.load %arg11[%c0_22, %c0_23] : memref<8x128xf32, #tpu.memory_space<vmem>>, vector<8x128xf32>
    tpu.vector_store %arg11[%c0_22, %c0_23], %10 {strides = array<i32>} : memref<8x128xf32, #tpu.memory_space<vmem>>, vector<8x128xf32>,
    %c0_24 = arith.constant 0 : index
    %c0_25 = arith.constant 0 : index
    %21 = vector.load %arg10[%c0_24, %c0_25] : memref<8x128xf32, #tpu.memory_space<vmem>>, vector<8x128xf32>
    tpu.vector_store %arg10[%c0_24, %c0_25], %19 {strides = array<i32>} : memref<8x128xf32, #tpu.memory_space<vmem>>, vector<8x128xf32>,
    return
  }
  func.func @transform_0(%arg0: i32) -> (i32, i32) {
    %c0_i32 = arith.constant 0 : i32
    %c0_i32_0 = arith.constant 0 : i32
    return %arg0, %c0_i32 : i32, i32
  }
  func.func @transform_1(%arg0: i32) -> (i32, i32) {
    %c0_i32 = arith.constant 0 : i32
    %c0_i32_0 = arith.constant 0 : i32
    return %arg0, %c0_i32 : i32, i32
  }
  func.func @transform_2(%arg0: i32) -> (i32, i32) {
    %c0_i32 = arith.constant 0 : i32
    %c0_i32_0 = arith.constant 0 : i32
    return %arg0, %c0_i32 : i32, i32
  }
  func.func @transform_3(%arg0: i32) -> (i32, i32) {
    %c0_i32 = arith.constant 0 : i32
    %c0_i32_0 = arith.constant 0 : i32
    %c0_i32_1 = arith.constant 0 : i32
    return %c0_i32, %c0_i32_0 : i32, i32
  }
  func.func @transform_4(%arg0: i32) -> (i32, i32) {
    %c0_i32 = arith.constant 0 : i32
    %c0_i32_0 = arith.constant 0 : i32
    %c0_i32_1 = arith.constant 0 : i32
    return %c0_i32, %c0_i32_0 : i32, i32
  }
  func.func @transform_5(%arg0: i32) -> (i32, i32) {
    %c0_i32 = arith.constant 0 : i32
    %c0_i32_0 = arith.constant 0 : i32
    %c0_i32_1 = arith.constant 0 : i32
    return %c0_i32, %c0_i32_0 : i32, i32
  }
  func.func @transform_6(%arg0: i32) -> (i32, i32) {
    %c0_i32 = arith.constant 0 : i32
    %c0_i32_0 = arith.constant 0 : i32
    %c0_i32_1 = arith.constant 0 : i32
    return %c0_i32, %c0_i32_0 : i32, i32
  }
  func.func @transform_7(%arg0: i32) -> (i32, i32) {
    %c0_i32 = arith.constant 0 : i32
    %c0_i32_0 = arith.constant 0 : i32
    %c0_i32_1 = arith.constant 0 : i32
    return %c0_i32, %c0_i32_0 : i32, i32
  }
  func.func @transform_8(%arg0: i32) -> (i32, i32) {
    %c0_i32 = arith.constant 0 : i32
    %c0_i32_0 = arith.constant 0 : i32
    %c0_i32_1 = arith.constant 0 : i32
    return %c0_i32, %c0_i32_0 : i32, i32
  }
  func.func @transform_9(%arg0: i32) -> (i32, i32) {
    %c0_i32 = arith.constant 0 : i32
    %c0_i32_0 = arith.constant 0 : i32
    return %arg0, %c0_i32 : i32, i32
  }
  func.func @transform_10(%arg0: i32) -> (i32, i32) {
    %c0_i32 = arith.constant 0 : i32
    %c0_i32_0 = arith.constant 0 : i32
    return %arg0, %c0_i32 : i32, i32
  }
}

</mosaic_0001>

<bundles_post_ra>
// kernel: _lambda_.1
= control target key start
LH: loop header
LB: loop body
LE: loop exit
PB: predicated region body
PF: predicated region fallthrough
CT: control target
= control target key end

     0   :  { %v1035_v0 = vmov 0.0|0.0   ;;  %vm1036_vm0 = vmmov 0   ;;  %v1037_v4 = vmov 0.0   ;;  %s1456_s4 = inlined_call_operand.vmem [shape: f32[128,128], index: 4, kind: input, shape index: {}]   ;;  %s1457_s7 = inlined_call_operand.vmem [shape: f32[128,128], index: 7, kind: input, shape index: {}]   ;;  %s1458_s3 = inlined_call_operand.vmem [shape: f32[128,128], index: 3, kind: input, shape index: {}]   ;;  %s1459_s1 = inlined_call_operand.vmem [shape: f32[8,128], index: 1, kind: input, shape index: {}]   ;;  %s1460_s6 = inlined_call_operand.vmem [shape: f32[128,128], index: 6, kind: input, shape index: {}]   ;;  %s1461_s5 = inlined_call_operand.vmem [shape: f32[128,128], index: 5, kind: input, shape index: {}]   ;;  %s1462_s0 = inlined_call_operand.vmem [shape: f32[8,128], index: 0, kind: input, shape index: {}]   ;;  %s1463_s8 = inlined_call_operand.vmem [shape: f32[128,128], index: 8, kind: input, shape index: {}]   ;;  %s1464_s2 = inlined_call_operand.vmem [shape: f32[8,128], index: 2, kind: input, shape index: {}]   ;;  %s1465_s10 = inlined_call_operand.vmem [shape: f32[8,128], index: 10, kind: output, shape index: {1}]   ;;  %s1466_s9 = inlined_call_operand.vmem [shape: f32[8,128], index: 9, kind: output, shape index: {0}]  }
   0x1   :  { %878 = vmatprep.subr.bf16.mxu0 %v1035_v0  ;;  %v53_v1 = vld [vmem:[%s1456_s4] sm:$0xff]  ;;  %v54_v2 = vld [vmem:[%s1456_s4 + $0x8] sm:$0xff]  ;;  %v55_v3 = vld [vmem:[%s1456_s4 + $0x10] sm:$0xff]  ;;  %700 = vmatprep.mubr.msk.f32.mxu0 %vm1036_vm0, %v1037_v4 }
   0x2   :  { %v879_v5 = vpack.c.bf16 %v54_v2, %v53_v1  ;;  %v56_v6 = vld [vmem:[%s1456_s4 + $0x18] sm:$0xff]  ;;  %950 = vmatprep.subr.bf16.mxu1 %v1035_v0  ;;  %805 = vmatprep.mubr.msk.f32.mxu1 %vm1036_vm0, %v1037_v4  ;;  %v57_v8 = vld [vmem:[%s1456_s4 + $0x20] sm:$0xff]  ;;  %v58_v9 = vld [vmem:[%s1456_s4 + $0x28] sm:$0xff] }
   0x3   :  { %v882_v7 = vpack.c.bf16 %v56_v6, %v55_v3  ;;  %v885_v10 = vpack.c.bf16 %v58_v9, %v57_v8  ;;  %v59_v11 = vld [vmem:[%s1456_s4 + $0x30] sm:$0xff]  ;;  %v60_v12 = vld [vmem:[%s1456_s4 + $0x38] sm:$0xff]  ;;  %v61_v14 = vld [vmem:[%s1456_s4 + $0x40] sm:$0xff] }
   0x4   :  { %880 = vmatpush3.bf16.msra.mxu0 %v879_v5  ;;  %v888_v13 = vpack.c.bf16 %v60_v12, %v59_v11  ;;  %v62_v15 = vld [vmem:[%s1456_s4 + $0x48] sm:$0xff]  ;;  %v63_v17 = vld [vmem:[%s1456_s4 + $0x50] sm:$0xff]  ;;  %v64_v18 = vld [vmem:[%s1456_s4 + $0x58] sm:$0xff] }
   0x5   :  { %881 = vmatprep.subr.bf16.mxu0 %v1035_v0  ;;  %v891_v16 = vpack.c.bf16 %v62_v15, %v61_v14  ;;  %v312_v19 = vld [vmem:[%s1457_s7] sm:$0xff]  ;;  %v313_v20 = vld [vmem:[%s1457_s7 + $0x8] sm:$0xff]  ;;  %v314_v21 = vld [vmem:[%s1457_s7 + $0x10] sm:$0xff]  ;;  %v894_v24 = vpack.c.bf16 %v64_v18, %v63_v17 }
   0x6   :  { %v951_v22 = vpack.c.bf16 %v313_v20, %v312_v19  ;;  %v315_v23 = vld [vmem:[%s1457_s7 + $0x18] sm:$0xff]  ;;  %v65_v25 = vld [vmem:[%s1456_s4 + $0x60] sm:$0xff]  ;;  %v66_v26 = vld [vmem:[%s1456_s4 + $0x68] sm:$0xff] }
   0x7   :  { %v954_v27 = vpack.c.bf16 %v315_v23, %v314_v21  ;;  %v316_v28 = vld [vmem:[%s1457_s7 + $0x20] sm:$0xff]  ;;  %v317_v29 = vld [vmem:[%s1457_s7 + $0x28] sm:$0xff]  ;;  %v897_v30 = vpack.c.bf16 %v66_v26, %v65_v25  ;;  %v67_v31 = vld [vmem:[%s1456_s4 + $0x70] sm:$0xff] }
   0x8   :  { %883 = vmatpush3.bf16.msra.mxu0 %v882_v7  ;;  %952 = vmatpush3.bf16.msra.mxu1 %v951_v22  ;;  %v68_v32 = vld [vmem:[%s1456_s4 + $0x78] sm:$0xff]  ;;  %v957_v33 = vpack.c.bf16 %v317_v29, %v316_v28  ;;  %v318_v34 = vld [vmem:[%s1457_s7 + $0x30] sm:$0xff]  ;;  %v37_v37 = vld [vmem:[%s1458_s3] sm:$0xff] }
   0x9   :  { %884 = vmatprep.subr.bf16.mxu0 %v1035_v0  ;;  %953 = vmatprep.subr.bf16.mxu1 %v1035_v0  ;;  %v319_v35 = vld [vmem:[%s1457_s7 + $0x38] sm:$0xff]  ;;  %v900_v36 = vpack.c.bf16 %v68_v32, %v67_v31  ;;  %v38_v38 = vld [vmem:[%s1458_s3 + $0x8] sm:$0xff]  ;;  %v320_v40 = vld [vmem:[%s1457_s7 + $0x40] sm:$0xff] }
   0xa   :  { %v960_v39 = vpack.c.bf16 %v319_v35, %v318_v34  ;;  %v321_v41 = vld [vmem:[%s1457_s7 + $0x48] sm:$0xff]  ;;  %v35_v42 = vld [vmem:[%s1459_s1] sm:$0xff]  ;;  %v903_v43 = vpack.c.bf16 %v38_v38, %v37_v37  ;;  %v39_v44 = vld [vmem:[%s1458_s3 + $0x10] sm:$0xff] }
   0xb   :  { %v40_v45 = vld [vmem:[%s1458_s3 + $0x18] sm:$0xff]  ;;  %v963_v46 = vpack.c.bf16 %v321_v41, %v320_v40  ;;  %v322_v47 = vld [vmem:[%s1457_s7 + $0x50] sm:$0xff]  ;;  %v41_v50 = vld [vmem:[%s1458_s3 + $0x20] sm:$0xff] }
   0xc   :  { %886 = vmatpush3.bf16.msra.mxu0 %v885_v10  ;;  %955 = vmatpush3.bf16.msra.mxu1 %v954_v27  ;;  %v323_v48 = vld [vmem:[%s1457_s7 + $0x58] sm:$0xff]  ;;  %v906_v49 = vpack.c.bf16 %v40_v45, %v39_v44  ;;  %v42_v51 = vld [vmem:[%s1458_s3 + $0x28] sm:$0xff]  ;;  %v324_v53 = vld [vmem:[%s1457_s7 + $0x60] sm:$0xff] }
   0xd   :  { %887 = vmatprep.subr.bf16.mxu0 %v1035_v0  ;;  %956 = vmatprep.subr.bf16.mxu1 %v1035_v0  ;;  %v966_v52 = vpack.c.bf16 %v323_v48, %v322_v47  ;;  %v325_v54 = vld [vmem:[%s1457_s7 + $0x68] sm:$0xff]  ;;  %v909_v55 = vpack.c.bf16 %v42_v51, %v41_v50  ;;  %v43_v56 = vld [vmem:[%s1458_s3 + $0x30] sm:$0xff]  ;;  %v44_v57 = vld [vmem:[%s1458_s3 + $0x38] sm:$0xff] }
   0xe   :  { %v969_v58 = vpack.c.bf16 %v325_v54, %v324_v53  ;;  %v326_v59 = vld [vmem:[%s1457_s7 + $0x70] sm:$0xff]  ;;  %v327_v60 = vld [vmem:[%s1457_s7 + $0x78] sm:$0xff]  ;;  %v912_v61 = vpack.c.bf16 %v44_v57, %v43_v56  ;;  %v45_v62 = vld [vmem:[%s1458_s3 + $0x40] sm:$0xff] }
   0xf   :  { %v46_v63 = vld [vmem:[%s1458_s3 + $0x48] sm:$0xff]  ;;  %v972_v1 = vpack.c.bf16 %v327_v60, %v326_v59  ;;  %v296_v2 = vld [vmem:[%s1460_s6] sm:$0xff]  ;;  %v47_v6 = vld [vmem:[%s1458_s3 + $0x50] sm:$0xff] }
  0x10   :  { %889 = vmatpush3.bf16.msra.mxu0 %v888_v13  ;;  %958 = vmatpush3.bf16.msra.mxu1 %v957_v33  ;;  %v297_v3 = vld [vmem:[%s1460_s6 + $0x8] sm:$0xff]  ;;  %v915_v5 = vpack.c.bf16 %v46_v63, %v45_v62  ;;  %v48_v7 = vld [vmem:[%s1458_s3 + $0x58] sm:$0xff]  ;;  %v298_v9 = vld [vmem:[%s1460_s6 + $0x10] sm:$0xff] }
  0x11   :  { %890 = vmatprep.subr.bf16.mxu0 %v1035_v0  ;;  %959 = vmatprep.subr.bf16.mxu1 %v1035_v0  ;;  %v975_v8 = vpack.c.bf16 %v297_v3, %v296_v2  ;;  %v299_v10 = vld [vmem:[%s1460_s6 + $0x18] sm:$0xff]  ;;  %v918_v11 = vpack.c.bf16 %v48_v7, %v47_v6  ;;  %v49_v12 = vld [vmem:[%s1458_s3 + $0x60] sm:$0xff]  ;;  %v50_v13 = vld [vmem:[%s1458_s3 + $0x68] sm:$0xff] }
  0x12   :  { %v978_v14 = vpack.c.bf16 %v299_v10, %v298_v9  ;;  %v300_v15 = vld [vmem:[%s1460_s6 + $0x20] sm:$0xff]  ;;  %v921_v17 = vpack.c.bf16 %v50_v13, %v49_v12  ;;  %v51_v18 = vld [vmem:[%s1458_s3 + $0x70] sm:$0xff]  ;;  %v52_v19 = vld [vmem:[%s1458_s3 + $0x78] sm:$0xff] }
  0x13   :  { %v302_v21 = vld [vmem:[%s1460_s6 + $0x30] sm:$0xff]  ;;  %v303_v22 = vld [vmem:[%s1460_s6 + $0x38] sm:$0xff]  ;;  %v924_v23 = vpack.c.bf16 %v52_v19, %v51_v18  ;;  %v210_v25 = vld [vmem:[%s1461_s5 + $0x8] sm:$0xff] }
  0x14   :  { %892 = vmatpush3.bf16.msra.mxu0 %v891_v16  ;;  %961 = vmatpush3.bf16.msra.mxu1 %v960_v39  ;;  %v301_v16 = vld [vmem:[%s1460_s6 + $0x28] sm:$0xff]  ;;  %v984_v26 = vpack.c.bf16 %v303_v22, %v302_v21  ;;  %v304_v27 = vld [vmem:[%s1460_s6 + $0x40] sm:$0xff]  ;;  %v211_v31 = vld [vmem:[%s1461_s5 + $0x10] sm:$0xff] }
  0x15   :  { %893 = vmatprep.subr.bf16.mxu0 %v1035_v0  ;;  %962 = vmatprep.subr.bf16.mxu1 %v1035_v0  ;;  %v981_v20 = vpack.c.bf16 %v301_v16, %v300_v15  ;;  %v305_v28 = vld [vmem:[%s1460_s6 + $0x48] sm:$0xff]  ;;  %v34_v29 = vld [vmem:[%s1462_s0] sm:$0xff]  ;;  %v212_v32 = vld [vmem:[%s1461_s5 + $0x18] sm:$0xff] }
  0x16   :  { %v987_v33 = vpack.c.bf16 %v305_v28, %v304_v27  ;;  %v306_v34 = vld [vmem:[%s1460_s6 + $0x50] sm:$0xff]  ;;  %v307_v35 = vld [vmem:[%s1460_s6 + $0x58] sm:$0xff]  ;;  %v213_v37 = vld [vmem:[%s1461_s5 + $0x20] sm:$0xff] }
  0x17   :  { %v214_v38 = vld [vmem:[%s1461_s5 + $0x28] sm:$0xff]  ;;  %v990_v39 = vpack.c.bf16 %v307_v35, %v306_v34  ;;  %v308_v40 = vld [vmem:[%s1460_s6 + $0x60] sm:$0xff]  ;;  %v216_v44 = vld [vmem:[%s1461_s5 + $0x38] sm:$0xff] }
  0x18   :  { %895 = vmatpush3.bf16.msra.mxu0 %v894_v24  ;;  %964 = vmatpush3.bf16.msra.mxu1 %v963_v46  ;;  %v209_v24 = vld [vmem:[%s1461_s5] sm:$0xff]  ;;  %v309_v41 = vld [vmem:[%s1460_s6 + $0x68] sm:$0xff]  ;;  %v310_v46 = vld [vmem:[%s1460_s6 + $0x70] sm:$0xff] }
  0x19   :  { %896 = vmatprep.subr.bf16.mxu0 %v1035_v0  ;;  %965 = vmatprep.subr.bf16.mxu1 %v1035_v0  ;;  %v993_v45 = vpack.c.bf16 %v309_v41, %v308_v40  ;;  %v311_v47 = vld [vmem:[%s1460_s6 + $0x78] sm:$0xff]  ;;  %v218_v50 = vld [vmem:[%s1461_s5 + $0x48] sm:$0xff]  ;;  %v36_v13 = vld [vmem:[%s1464_s2] sm:$0xff] }
  0x1a   :  { %v996_v51 = vpack.c.bf16 %v311_v47, %v310_v46  ;;  %v469_v53 = vld [vmem:[%s1463_s8 + $0x8] sm:$0xff]  ;;  %v220_v56 = vld [vmem:[%s1461_s5 + $0x58] sm:$0xff]  ;;  %v478_v15 = vld [vmem:[%s1463_s8 + $0x50] sm:$0xff] }
  0x1b   :  { %v471_v59 = vld [vmem:[%s1463_s8 + $0x18] sm:$0xff]  ;;  %v222_v62 = vld [vmem:[%s1461_s5 + $0x68] sm:$0xff]  ;;  %v480_v18 = vld [vmem:[%s1463_s8 + $0x60] sm:$0xff] }
  0x1c   :  { %898 = vmatpush3.bf16.msra.mxu0 %v897_v30  ;;  %967 = vmatpush3.bf16.msra.mxu1 %v966_v52  ;;  %v927_v30 = vpack.c.bf16 %v210_v25, %v209_v24  ;;  %v468_v52 = vld [vmem:[%s1463_s8] sm:$0xff]  ;;  %v473_v2 = vld [vmem:[%s1463_s8 + $0x28] sm:$0xff]  ;;  %v224_v6 = vld [vmem:[%s1461_s5 + $0x78] sm:$0xff] }
  0x1d   :  { %899 = vmatprep.subr.bf16.mxu0 %v1035_v0  ;;  %968 = vmatprep.subr.bf16.mxu1 %v1035_v0  ;;  %v999_v57 = vpack.c.bf16 %v469_v53, %v468_v52  ;;  %v477_v12 = vld [vmem:[%s1463_s8 + $0x48] sm:$0xff]  ;;  %v479_v16 = vld [vmem:[%s1463_s8 + $0x58] sm:$0xff]  ;;  %v482_v21 = vld [vmem:[%s1463_s8 + $0x70] sm:$0xff] }
  0x1e   :  { %v481_v19 = vld [vmem:[%s1463_s8 + $0x68] sm:$0xff]  ;;  %v483_v22 = vld [vmem:[%s1463_s8 + $0x78] sm:$0xff] }
  0x20   :  { %901 = vmatpush3.bf16.msra.mxu0 %v900_v36  ;;  %970 = vmatpush3.bf16.msra.mxu1 %v969_v58  ;;  %v930_v36 = vpack.c.bf16 %v212_v32, %v211_v31  ;;  %v470_v58 = vld [vmem:[%s1463_s8 + $0x10] sm:$0xff] }
  0x21   :  { %902 = vmatprep.subr.bf16.mxu0 %v1035_v0  ;;  %971 = vmatprep.subr.bf16.mxu1 %v1035_v0  ;;  %v1002_v63 = vpack.c.bf16 %v471_v59, %v470_v58 }
  0x23   :  { %701 = vmatmul.mubr.f32.vlgmr.msra.gmra.mrb[0].mxu0 %v35_v42 }
  0x24   :  { %904 = vmatpush3.bf16.msra.mxu0 %v903_v43  ;;  %735 = vmatprep.mubr.msk.f32.mxu0 %vm1036_vm0, %v1037_v4  ;;  %v215_v43 = vld [vmem:[%s1461_s5 + $0x30] sm:$0xff] }
  0x25   :  { %905 = vmatprep.subr.bf16.mxu0 %v1035_v0  ;;  %973 = vmatpush3.bf16.msra.mxu1 %v972_v1  ;;  %v936_v48 = vpack.c.bf16 %v216_v44, %v215_v43  ;;  %v472_v1 = vld [vmem:[%s1463_s8 + $0x20] sm:$0xff] }
  0x26   :  { %974 = vmatprep.subr.bf16.mxu1 %v1035_v0  ;;  %v1005_v7 = vpack.c.bf16 %v473_v2, %v472_v1 }
  0x28   :  { %907 = vmatpush3.bf16.msra.mxu0 %v906_v49  ;;  %806 = vmatmul.mubr.f32.vlgmr.msra.gmra.mrb[0].mxu1 %v35_v42  ;;  %v933_v42 = vpack.c.bf16 %v214_v38, %v213_v37  ;;  %v217_v49 = vld [vmem:[%s1461_s5 + $0x40] sm:$0xff] }
  0x29   :  { %908 = vmatprep.subr.bf16.mxu0 %v1035_v0  ;;  %976 = vmatpush3.bf16.msra.mxu1 %v975_v8  ;;  %v939_v54 = vpack.c.bf16 %v218_v50, %v217_v49  ;;  %v475_v8 = vld [vmem:[%s1463_s8 + $0x38] sm:$0xff] }
  0x2a   :  { %977 = vmatprep.subr.bf16.mxu1 %v1035_v0  ;;  %840 = vmatprep.mubr.msk.f32.mxu1 %vm1036_vm0, %v1037_v4 }
  0x2c   :  { %910 = vmatpush3.bf16.msra.mxu0 %v909_v55  ;;  %v219_v55 = vld [vmem:[%s1461_s5 + $0x50] sm:$0xff] }
  0x2d   :  { %911 = vmatprep.subr.bf16.mxu0 %v1035_v0  ;;  %979 = vmatpush3.bf16.msra.mxu1 %v978_v14  ;;  %v942_v60 = vpack.c.bf16 %v220_v56, %v219_v55 }
  0x2e   :  { %980 = vmatprep.subr.bf16.mxu1 %v1035_v0 }
  0x30   :  { %913 = vmatpush3.bf16.msra.mxu0 %v912_v61  ;;  %v221_v61 = vld [vmem:[%s1461_s5 + $0x60] sm:$0xff] }
  0x31   :  { %914 = vmatprep.subr.bf16.mxu0 %v1035_v0  ;;  %982 = vmatpush3.bf16.msra.mxu1 %v981_v20  ;;  %v945_v3 = vpack.c.bf16 %v222_v62, %v221_v61  ;;  %v1017_v20 = vpack.c.bf16 %v481_v19, %v480_v18 }
  0x32   :  { %983 = vmatprep.subr.bf16.mxu1 %v1035_v0 }
  0x34   :  { %916 = vmatpush3.bf16.msra.mxu0 %v915_v5  ;;  %v223_v5 = vld [vmem:[%s1461_s5 + $0x70] sm:$0xff] }
  0x35   :  { %917 = vmatprep.subr.bf16.mxu0 %v1035_v0  ;;  %985 = vmatpush3.bf16.msra.mxu1 %v984_v26  ;;  %v948_v9 = vpack.c.bf16 %v224_v6, %v223_v5 }
  0x36   :  { %986 = vmatprep.subr.bf16.mxu1 %v1035_v0 }
  0x38   :  { %919 = vmatpush3.bf16.msra.mxu0 %v918_v11  ;;  %v476_v11 = vld [vmem:[%s1463_s8 + $0x40] sm:$0xff] }
  0x39   :  { %920 = vmatprep.subr.bf16.mxu0 %v1035_v0  ;;  %988 = vmatpush3.bf16.msra.mxu1 %v987_v33  ;;  %v1011_v14 = vpack.c.bf16 %v477_v12, %v476_v11 }
  0x3a   :  { %989 = vmatprep.subr.bf16.mxu1 %v1035_v0 }
  0x3c   :  { %922 = vmatpush3.bf16.msra.mxu0 %v921_v17  ;;  %v1014_v17 = vpack.c.bf16 %v479_v16, %v478_v15 }
  0x3d   :  { %923 = vmatprep.subr.bf16.mxu0 %v1035_v0  ;;  %991 = vmatpush3.bf16.msra.mxu1 %v990_v39 }
  0x3e   :  { %992 = vmatprep.subr.bf16.mxu1 %v1035_v0 }
  0x40   :  { %925 = vmatpush3.bf16.msra.mxu0 %v924_v23  ;;  %v1020_v23 = vpack.c.bf16 %v483_v22, %v482_v21 }
  0x41   :  { %926 = vmatprep.subr.bf16.mxu0 %v1035_v0  ;;  %994 = vmatpush3.bf16.msra.mxu1 %v993_v45 }
  0x42   :  { %995 = vmatprep.subr.bf16.mxu1 %v1035_v0 }
  0x43   :  { %736 = vmatmul.mubr.f32.vlgmr.msra.gmra.mrb[0].mxu0 %v34_v29 }
  0x44   :  { %928 = vmatpush3.bf16.msra.mxu0 %v927_v30  ;;  %770 = vmatprep.mubr.msk.f32.mxu0 %vm1036_vm0, %v1037_v4 }
  0x45   :  { %929 = vmatprep.subr.bf16.mxu0 %v1035_v0  ;;  %997 = vmatpush3.bf16.msra.mxu1 %v996_v51 }
  0x46   :  { %998 = vmatprep.subr.bf16.mxu1 %v1035_v0 }
  0x48   :  { %931 = vmatpush3.bf16.msra.mxu0 %v930_v36  ;;  %841 = vmatmul.mubr.f32.vlgmr.msra.gmra.mrb[0].mxu1 %v34_v29 }
  0x49   :  { %932 = vmatprep.subr.bf16.mxu0 %v1035_v0  ;;  %1000 = vmatpush3.bf16.msra.mxu1 %v999_v57 }
  0x4a   :  { %1001 = vmatprep.subr.bf16.mxu1 %v1035_v0  ;;  %875 = vmatprep.mubr.msk.f32.mxu1 %vm1036_vm0, %v1037_v4  ;;  %v474_v4 = vld [vmem:[%s1463_s8 + $0x30] sm:$0xff] }
  0x4b   :  { %v1008_v10 = vpack.c.bf16 %v475_v8, %v474_v4 }
  0x4c   :  { %934 = vmatpush3.bf16.msra.mxu0 %v933_v42 }
  0x4d   :  { %935 = vmatprep.subr.bf16.mxu0 %v1035_v0  ;;  %1003 = vmatpush3.bf16.msra.mxu1 %v1002_v63 }
  0x4e   :  { %1004 = vmatprep.subr.bf16.mxu1 %v1035_v0 }
  0x50   :  { %937 = vmatpush3.bf16.msra.mxu0 %v936_v48 }
  0x51   :  { %938 = vmatprep.subr.bf16.mxu0 %v1035_v0  ;;  %1006 = vmatpush3.bf16.msra.mxu1 %v1005_v7 }
  0x52   :  { %1007 = vmatprep.subr.bf16.mxu1 %v1035_v0 }
  0x54   :  { %940 = vmatpush3.bf16.msra.mxu0 %v939_v54 }
  0x55   :  { %941 = vmatprep.subr.bf16.mxu0 %v1035_v0  ;;  %1009 = vmatpush3.bf16.msra.mxu1 %v1008_v10 }
  0x56   :  { %1010 = vmatprep.subr.bf16.mxu1 %v1035_v0 }
  0x58   :  { %943 = vmatpush3.bf16.msra.mxu0 %v942_v60 }
  0x59   :  { %944 = vmatprep.subr.bf16.mxu0 %v1035_v0  ;;  %1012 = vmatpush3.bf16.msra.mxu1 %v1011_v14 }
  0x5a   :  { %1013 = vmatprep.subr.bf16.mxu1 %v1035_v0 }
  0x5c   :  { %946 = vmatpush3.bf16.msra.mxu0 %v945_v3 }
  0x5d   :  { %947 = vmatprep.subr.bf16.mxu0 %v1035_v0  ;;  %1015 = vmatpush3.bf16.msra.mxu1 %v1014_v17 }
  0x5e   :  { %1016 = vmatprep.subr.bf16.mxu1 %v1035_v0 }
  0x60   :  { %949 = vmatpush3.bf16.msra.mxu0 %v948_v9 }
  0x61   :  { %1018 = vmatpush3.bf16.msra.mxu1 %v1017_v20 }
  0x62   :  { %1019 = vmatprep.subr.bf16.mxu1 %v1035_v0 }
  0x63   :  { %771 = vmatmul.mubr.f32.vlgmr.msra.gmra.mrb[0].mxu0 %v36_v13 }
  0x65   :  { %1021 = vmatpush3.bf16.msra.mxu1 %v1020_v23 }
 0x136   :  { %v291_v24 = vpop.f32.mrb[0].mxu0 }
 0x137   :  { %556 = vst [vmem:[%s1465_s10] sm:$0xff] %v291_v24  ;;  %v772_v25 = vpop.f32.mrb[1].mxu0  ;;  %876 = vmatmul.mubr.f32.vlgmr.msra.gmra.mrb[0].mxu1 %v291_v24 }
 0x20a   :  { %v550_v26 = vpop.f32.mrb[0].mxu1 }
 0x20b   :  { %1033 = vtanh.f32 %v550_v26  ;;  %v877_v27 = vpop.f32.mrb[1].mxu1 }
 0x215   :  { %v1034_v28 = vpop.eup %1033 }
 0x216   :  { %557 = vst [vmem:[%s1466_s9] sm:$0xff] %v1034_v28 }

</bundles_post_ra>
